<compile_context>
chip_gen: v6e
topology: v6e:2x2x1
jax: 0.10.0
libtpu: 0.0.40
codegen_flags: <defaults>
</compile_context>

<pallas_src>
import functools

import jax
import jax.numpy as jnp
from jax.experimental import pallas as pl
from jax.experimental.pallas import tpu as pltpu

# "config" equivalents (synthetic, small)
D_ENCODER = 32          # d_encoder
CONV_KERNEL_SIZE = 3    # conv_kernel_size (odd => same-length output)
P_DROP = 0.1            # unused in eval mode
LN_EPS = 1e-5
BN_EPS = 1e-5


def _conv_module_kernel(x_ref, vec_ref, w1_ref, w2_ref, w3_ref, o_ref, *,
                        d, k, t, tap_group, mxu_dtype):
    """One grid step processes a (rows, D) slab of whole samples (rows % t == 0)."""
    x = x_ref[...].astype(jnp.float32)              # (R, D), rows = samples*time
    r = x.shape[0]

    v = vec_ref[...]                                # (8, 2D) packed per-channel vectors
    ln_g = v[0:1, :d]
    ln_b = v[1:2, :d]
    b1 = v[2:3, :]
    bn_sc = v[3:4, :d]
    bn_sh = v[4:5, :d]
    b3 = v[5:6, :d]

    # ---- LayerNorm over feature dim D (f32; reuse the centered tensor) ----
    mu = jnp.mean(x, axis=-1, keepdims=True)
    xc = x - mu
    var = jnp.mean(xc * xc, axis=-1, keepdims=True)
    h = xc * jax.lax.rsqrt(var + LN_EPS) * ln_g + ln_b

    # ---- pointwise Conv1d(D -> 2D) + bias, then GLU ----
    y = jnp.dot(h.astype(mxu_dtype), w1_ref[...],
                preferred_element_type=jnp.float32) + b1
    g = y[:, :d] * jax.nn.sigmoid(y[:, d:])         # (R, D), f32

    # ---- Conv1d(D -> D, kernel=k, pad=k//2, no bias) as grouped matmuls ----
    # Tap kk of the conv is g @ w2[kk] realigned by off = kk - pad rows.  Taps
    # are computed <= tap_group at a time (bounded (R, tap_group*D) temp), then
    # realigned with a static sublane pltpu.roll and masked with a per-offset
    # (R, 1) multiplier so taps never leak across sample boundaries.
    pad = k // 2
    lt = jax.lax.broadcasted_iota(jnp.int32, (r, 1), 0)   # row index within block
    if (t & (t - 1)) == 0:                                # local time index
        lt = lt & (t - 1)
    else:
        lt = jax.lax.rem(lt, t)
    masks = {}                                            # built once, reused per tap
    for off in range(-pad, k - pad):
        if off == 0:
            continue
        valid = (lt + off >= 0) & (lt + off < t)
        masks[off] = valid.astype(jnp.float32)            # (R, 1)

    g_mxu = g.astype(mxu_dtype)
    acc = jnp.zeros((r, d), jnp.float32)
    n_groups = (k + tap_group - 1) // tap_group
    for gi in range(n_groups):                            # static unroll
        k0 = gi * tap_group
        k1 = min(k, k0 + tap_group)
        y2 = jnp.dot(g_mxu, w2_ref[:, k0 * d:k1 * d],
                     preferred_element_type=jnp.float32)  # (R, (k1-k0)*D)
        for kk in range(k0, k1):
            off = kk - pad
            piece = y2[:, (kk - k0) * d:(kk - k0 + 1) * d]
            if off == 0:
                acc = acc + piece
            else:
                piece = pltpu.roll(piece, shift=(-off) % r, axis=0)  # out[i] = in[i+off]
                acc = acc + piece * masks[off]

    # ---- BatchNorm1d (eval, folded to scale/shift) + SiLU ----
    bn = acc * bn_sc + bn_sh
    s = bn * jax.nn.sigmoid(bn)

    # ---- pointwise Conv1d(D -> D) + bias, Dropout (eval: identity), residual ----
    out = jnp.dot(s.astype(mxu_dtype), w3_ref[...],
                  preferred_element_type=jnp.float32) + b3
    o_ref[...] = (x + out).astype(o_ref.dtype)


def _choose_samples_per_block(batch, t, target_rows):
    """Largest whole-sample row block <= target_rows, preferring >= 2 blocks.

    Blocks must contain whole samples (roll+mask tap realignment relies on
    sample boundaries coinciding with block boundaries) and, when there is
    more than one block, rows must be a multiple of 8 (sublane constraint).
    """
    candidates = []
    for spb in range(1, batch + 1):
        if batch % spb:
            continue
        rows = spb * t
        blocks = batch // spb
        if blocks > 1 and rows % 8:
            continue
        candidates.append((spb, rows, blocks))
    # candidates is never empty: spb == batch (single block, full-dim rows) is legal.
    fitting = [c for c in candidates if c[1] <= target_rows]
    pool = fitting if fitting else [candidates[0]]        # smallest valid if none fit
    multi = [c for c in pool if c[2] >= 2]                # prefer pipelined (>=2 blocks)
    pool = multi if multi else pool
    best = max(pool, key=lambda c: c[1])                  # biggest tile in the pool
    return best[0]


def _vmem_limit_bytes(rows, d, k, tap_group):
    """Conservative per-block VMEM budget (bytes) with headroom."""
    gd = min(k, tap_group) * d
    io = 2 * 2 * rows * d * 4                             # double-buffered x + out blocks
    weights = 2 * ((8 * 2 * d) * 4                        # packed vectors (f32)
                   + (d * 2 * d + d * k * d + d * d) * 2)  # w1/w2wide/w3 (bf16), 2x buffered
    temps = 4 * rows * (d + d + 2 * d + d + gd + 3 * d)   # x,h,y,g,y2,acc/bn/s (f32)
    temps += 2 * rows * 2 * d                             # bf16 casts of MXU operands
    est = io + weights + temps
    return int(min(max(int(1.5 * est) + (2 << 20), 16 << 20), 48 << 20))


def convolution_module(x, params, *, target_block_rows=512, tap_group=4,
                       mxu_dtype=jnp.bfloat16):
    """x: (B, T, D) float32.  params: see init_params.

    target_block_rows: row-tile target (whole samples, multiple of 8); ~512
    gives near-roofline HBM utilization and, at production B*T, many blocks so
    both v7x TensorCores get several 'parallel' blocks each.  tap_group caps
    the (rows, tap_group*D) conv intermediate for large Conformer K.
    """
    B, T, D = x.shape
    K = params["w2"].shape[0]
    BT = B * T

    spb = _choose_samples_per_block(B, T, target_block_rows)
    rows = spb * T
    num_blocks = B // spb
    assert rows % T == 0, "row blocks must contain whole samples"
    assert num_blocks == 1 or rows % 8 == 0, "multi-block rows must be a multiple of 8"

    x_flat = x.reshape(BT, D)

    # Fold BatchNorm (running stats) into one scale + shift.
    bn_scale = params["bn_g"] * jax.lax.rsqrt(params["bn_v"] + BN_EPS)
    bn_shift = params["bn_b"] - params["bn_m"] * bn_scale

    # Pack all small per-channel vectors into a single (8, 2D) operand.
    vecs = jnp.zeros((8, 2 * D), jnp.float32)
    vecs = vecs.at[0, :D].set(params["ln_g"])
    vecs = vecs.at[1, :D].set(params["ln_b"])
    vecs = vecs.at[2, :].set(params["b1"])
    vecs = vecs.at[3, :D].set(bn_scale)
    vecs = vecs.at[4, :D].set(bn_shift)
    vecs = vecs.at[5, :D].set(params["b3"])

    # MXU operands in bf16 (f32 accumulation).  The K conv taps are laid out
    # along the output dim; the kernel consumes them tap_group at a time.
    w1 = params["w1"].astype(mxu_dtype)                                   # (D, 2D)
    w2w = jnp.transpose(params["w2"], (1, 0, 2)).reshape(D, K * D)
    w2w = w2w.astype(mxu_dtype)                                           # (D, K*D)
    w3 = params["w3"].astype(mxu_dtype)                                   # (D, D)

    kernel = functools.partial(_conv_module_kernel, d=D, k=K, t=T,
                               tap_group=tap_group, mxu_dtype=mxu_dtype)

    flops = 2 * BT * D * D * (K + 3) + 12 * BT * D
    transcendentals = 2 * BT * D + BT
    bytes_accessed = (2 * BT * D * 4
                      + (D * 2 * D + D * K * D + D * D) * 2
                      + 8 * 2 * D * 4)

    out_flat = pl.pallas_call(
        kernel,
        out_shape=jax.ShapeDtypeStruct((BT, D), x.dtype),
        grid_spec=pltpu.PrefetchScalarGridSpec(
            num_scalar_prefetch=0,
            grid=(num_blocks,),
            in_specs=[
                pl.BlockSpec((rows, D), lambda i: (i, 0)),        # x rows (pipelined)
                pl.BlockSpec((8, 2 * D), lambda i: (0, 0)),       # packed vectors
                pl.BlockSpec((D, 2 * D), lambda i: (0, 0)),       # W1
                pl.BlockSpec((D, K * D), lambda i: (0, 0)),       # W2 (wide)
                pl.BlockSpec((D, D), lambda i: (0, 0)),           # W3
            ],
            out_specs=pl.BlockSpec((rows, D), lambda i: (i, 0)),
        ),
        compiler_params=pltpu.CompilerParams(
            dimension_semantics=("parallel",),                    # v7x TC sharding
            vmem_limit_bytes=_vmem_limit_bytes(rows, D, K, tap_group),
        ),
        cost_estimate=pl.CostEstimate(
            flops=flops,
            transcendentals=transcendentals,
            bytes_accessed=bytes_accessed,
        ),
    )(x_flat, vecs, w1, w2w, w3)
    return out_flat.reshape(B, T, D)


def init_params(key, d, k):
    """Deterministic synthetic parameters (PyTorch shapes noted in comments)."""
    ks = jax.random.split(key, 5)
    scale = 0.05
    return {
        # LayerNorm(d): weight (d,), bias (d,)
        "ln_g": jnp.ones((d,), jnp.float32),
        "ln_b": jnp.zeros((d,), jnp.float32),
        # Conv1d(d, 2d, 1): torch weight (2d, d, 1) -> stored as (d, 2d)
        "w1": scale * jax.random.normal(ks[0], (d, 2 * d), jnp.float32),
        "b1": scale * jax.random.normal(ks[1], (2 * d,), jnp.float32),
        # Conv1d(d, d, k): torch weight (d_out, d_in, k) -> stored as (k, d_in, d_out)
        "w2": scale * jax.random.normal(ks[2], (k, d, d), jnp.float32),
        # BatchNorm1d(d): gamma/beta + running stats (fresh init, eval mode)
        "bn_g": jnp.ones((d,), jnp.float32),
        "bn_b": jnp.zeros((d,), jnp.float32),
        "bn_m": jnp.zeros((d,), jnp.float32),
        "bn_v": jnp.ones((d,), jnp.float32),
        # Conv1d(d, d, 1): stored as (d_in, d_out)
        "w3": scale * jax.random.normal(ks[3], (d, d), jnp.float32),
        "b3": scale * jax.random.normal(ks[4], (d,), jnp.float32),
    }


def reference(x, p, *, mxu_dtype=jnp.bfloat16):
    """Pure-JAX eval-mode forward with identical bf16 MXU-operand rounding."""
    d = x.shape[-1]
    mu = jnp.mean(x, axis=-1, keepdims=True)
    xc = x - mu
    var = jnp.mean(xc * xc, axis=-1, keepdims=True)
    h = xc * jax.lax.rsqrt(var + LN_EPS) * p["ln_g"] + p["ln_b"]
    y = jnp.einsum("btd,de->bte", h.astype(mxu_dtype), p["w1"].astype(mxu_dtype),
                   preferred_element_type=jnp.float32) + p["b1"]
    g = y[..., :d] * jax.nn.sigmoid(y[..., d:])
    k = p["w2"].shape[0]
    pad = k // 2
    gp = jnp.pad(g, ((0, 0), (pad, pad), (0, 0)))
    acc = sum(
        jnp.einsum("btd,de->bte",
                   gp[:, kk:kk + x.shape[1], :].astype(mxu_dtype),
                   p["w2"][kk].astype(mxu_dtype),
                   preferred_element_type=jnp.float32)
        for kk in range(k))
    bn = (acc - p["bn_m"]) * jax.lax.rsqrt(p["bn_v"] + BN_EPS)
    bn = bn * p["bn_g"] + p["bn_b"]
    s = bn * jax.nn.sigmoid(bn)
    out = jnp.einsum("btd,de->bte", s.astype(mxu_dtype), p["w3"].astype(mxu_dtype),
                     preferred_element_type=jnp.float32) + p["b3"]
    return x + out


if __name__ == "__main__":
    key = jax.random.PRNGKey(0)

    # Primary test: module's synthetic config (exercises 2 pipelined row blocks).
    B, T, D, K = 2, 16, D_ENCODER, CONV_KERNEL_SIZE
    kx, kp, kx2, kp2 = jax.random.split(key, 4)
    x = jax.random.normal(kx, (B, T, D), jnp.float32)
    params = init_params(kp, D, K)
    out = jax.block_until_ready(convolution_module(x, params))
    ref = reference(x, params)
    assert out.shape == (B, T, D)
    assert jnp.allclose(out, ref, atol=1e-3, rtol=1e-3), "mismatch vs reference (K=3)"

    # Secondary test: non-power-of-two T and K=5 with tap grouping (2 taps/matmul),
    # exercising the rem() time-index path and the multi-group conv path.
    B2, T2, K2 = 2, 24, 5
    x2 = jax.random.normal(kx2, (B2, T2, D), jnp.float32)
    params2 = init_params(kp2, D, K2)
    out2 = jax.block_until_ready(
        convolution_module(x2, params2, tap_group=2))
    ref2 = reference(x2, params2)
    assert out2.shape == (B2, T2, D)
    assert jnp.allclose(out2, ref2, atol=1e-3, rtol=1e-3), "mismatch vs reference (K=5)"

    print("KERNEL_OK")
</pallas_src>

<mosaic_0001>
module attributes {stable_mosaic.version = 11 : i64} {
  func.func @_conv_module_kernel(%arg0: i32, %arg1: memref<16x32xf32, #tpu.memory_space<vmem>>, %arg2: memref<8x64xf32, #tpu.memory_space<vmem>>, %arg3: memref<32x64xbf16, #tpu.memory_space<vmem>>, %arg4: memref<32x96xbf16, #tpu.memory_space<vmem>>, %arg5: memref<32x32xbf16, #tpu.memory_space<vmem>>, %arg6: memref<16x32xf32, #tpu.memory_space<vmem>>) attributes {dimension_semantics = [#tpu.dimension_semantics<parallel>], iteration_bounds = array<i64: 2>, scalar_prefetch = 0 : i64, scratch_operands = 0 : i64, tpu.core_type = #tpu.core_type<tc>, window_params = [{transform_indices = @transform_0, window_bounds = array<i64: 16, 32>}, {pipeline_mode = #tpu.pipeline_mode<synchronous>, transform_indices = @transform_1, window_bounds = array<i64: 8, 64>}, {pipeline_mode = #tpu.pipeline_mode<synchronous>, transform_indices = @transform_2, window_bounds = array<i64: 32, 64>}, {pipeline_mode = #tpu.pipeline_mode<synchronous>, transform_indices = @transform_3, window_bounds = array<i64: 32, 96>}, {pipeline_mode = #tpu.pipeline_mode<synchronous>, transform_indices = @transform_4, window_bounds = array<i64: 32, 32>}, {transform_indices = @transform_5, window_bounds = array<i64: 16, 32>}]} {
    %c0 = arith.constant 0 : index
    %c0_0 = arith.constant 0 : index
    %0 = vector.load %arg1[%c0, %c0_0] : memref<16x32xf32, #tpu.memory_space<vmem>>, vector<16x32xf32>
    %c0_1 = arith.constant 0 : index
    %c0_2 = arith.constant 0 : index
    %1 = vector.load %arg2[%c0_1, %c0_2] : memref<8x64xf32, #tpu.memory_space<vmem>>, vector<8x64xf32>
    %2 = vector.extract_strided_slice %1 {offsets = [0, 0], sizes = [1, 32], strides = [1, 1]} : vector<8x64xf32> to vector<1x32xf32>
    %3 = vector.extract_strided_slice %1 {offsets = [1, 0], sizes = [1, 32], strides = [1, 1]} : vector<8x64xf32> to vector<1x32xf32>
    %4 = vector.extract_strided_slice %1 {offsets = [2, 0], sizes = [1, 64], strides = [1, 1]} : vector<8x64xf32> to vector<1x64xf32>
    %5 = vector.extract_strided_slice %1 {offsets = [3, 0], sizes = [1, 32], strides = [1, 1]} : vector<8x64xf32> to vector<1x32xf32>
    %6 = vector.extract_strided_slice %1 {offsets = [4, 0], sizes = [1, 32], strides = [1, 1]} : vector<8x64xf32> to vector<1x32xf32>
    %7 = vector.extract_strided_slice %1 {offsets = [5, 0], sizes = [1, 32], strides = [1, 1]} : vector<8x64xf32> to vector<1x32xf32>
    %cst = arith.constant dense<0.000000e+00> : vector<16xf32>
    %8 = vector.multi_reduction <add>, %0, %cst [1] : vector<16x32xf32> to vector<16xf32>
    %9 = vector.shape_cast %8 : vector<16xf32> to vector<16x1xf32>
    %cst_3 = arith.constant 3.200000e+01 : f32
    %10 = vector.broadcast %cst_3 : f32 to vector<16x1xf32>
    %11 = arith.divf %9, %10 : vector<16x1xf32>
    %12 = vector.broadcast %11 : vector<16x1xf32> to vector<16x32xf32>
    %13 = arith.subf %0, %12 : vector<16x32xf32>
    %14 = arith.mulf %13, %13 : vector<16x32xf32>
    %cst_4 = arith.constant dense<0.000000e+00> : vector<16xf32>
    %15 = vector.multi_reduction <add>, %14, %cst_4 [1] : vector<16x32xf32> to vector<16xf32>
    %16 = vector.shape_cast %15 : vector<16xf32> to vector<16x1xf32>
    %cst_5 = arith.constant 3.200000e+01 : f32
    %17 = vector.broadcast %cst_5 : f32 to vector<16x1xf32>
    %18 = arith.divf %16, %17 : vector<16x1xf32>
    %cst_6 = arith.constant 9.99999974E-6 : f32
    %19 = vector.broadcast %cst_6 : f32 to vector<16x1xf32>
    %20 = arith.addf %18, %19 : vector<16x1xf32>
    %21 = math.rsqrt %20 : vector<16x1xf32>
    %22 = vector.broadcast %21 : vector<16x1xf32> to vector<16x32xf32>
    %23 = arith.mulf %13, %22 : vector<16x32xf32>
    %24 = vector.broadcast %2 : vector<1x32xf32> to vector<16x32xf32>
    %25 = arith.mulf %23, %24 : vector<16x32xf32>
    %26 = vector.broadcast %3 : vector<1x32xf32> to vector<16x32xf32>
    %27 = arith.addf %25, %26 : vector<16x32xf32>
    %28 = arith.truncf %27 : vector<16x32xf32> to vector<16x32xbf16>
    %c0_7 = arith.constant 0 : index
    %c0_8 = arith.constant 0 : index
    %29 = vector.load %arg3[%c0_7, %c0_8] : memref<32x64xbf16, #tpu.memory_space<vmem>>, vector<32x64xbf16>
    %cst_9 = arith.constant dense<0.000000e+00> : vector<16x64xf32>
    %30 = tpu.matmul %28, %29, %cst_9 {dimension_numbers = #tpu.dot_dimension_numbers<[1], [0], [0], [1], [0, 0, 1, 1], [], []>} : vector<16x32xbf16>, vector<32x64xbf16>, vector<16x64xf32> -> vector<16x64xf32>
    %31 = vector.broadcast %4 : vector<1x64xf32> to vector<16x64xf32>
    %32 = arith.addf %30, %31 : vector<16x64xf32>
    %33 = vector.extract_strided_slice %32 {offsets = [0, 0], sizes = [16, 32], strides = [1, 1]} : vector<16x64xf32> to vector<16x32xf32>
    %34 = vector.extract_strided_slice %32 {offsets = [0, 32], sizes = [16, 32], strides = [1, 1]} : vector<16x64xf32> to vector<16x32xf32>
    %35 = arith.negf %34 : vector<16x32xf32>
    %36 = math.exp %35 : vector<16x32xf32>
    %cst_10 = arith.constant 1.000000e+00 : f32
    %37 = vector.broadcast %cst_10 : f32 to vector<16x32xf32>
    %38 = arith.addf %37, %36 : vector<16x32xf32>
    %39 = arith.divf %37, %38 : vector<16x32xf32>
    %40 = arith.mulf %33, %39 : vector<16x32xf32>
    %41 = tpu.iota {dimensions = array<i32: 0>} : vector<16x1xi32>
    %c15_i32 = arith.constant 15 : i32
    %42 = vector.broadcast %c15_i32 : i32 to vector<16x1xi32>
    %43 = arith.andi %41, %42 : vector<16x1xi32>
    %c-1_i32 = arith.constant -1 : i32
    %44 = vector.broadcast %c-1_i32 : i32 to vector<16x1xi32>
    %45 = arith.addi %43, %44 : vector<16x1xi32>
    %c0_i32 = arith.constant 0 : i32
    %46 = vector.broadcast %c0_i32 : i32 to vector<16x1xi32>
    %47 = arith.cmpi sge, %45, %46 : vector<16x1xi32>
    %c-1_i32_11 = arith.constant -1 : i32
    %48 = vector.broadcast %c-1_i32_11 : i32 to vector<16x1xi32>
    %49 = arith.addi %43, %48 : vector<16x1xi32>
    %c16_i32 = arith.constant 16 : i32
    %50 = vector.broadcast %c16_i32 : i32 to vector<16x1xi32>
    %51 = arith.cmpi slt, %49, %50 : vector<16x1xi32>
    %52 = arith.andi %47, %51 : vector<16x1xi1>
    %53 = arith.extui %52 : vector<16x1xi1> to vector<16x1xi32>
    %54 = arith.sitofp %53 : vector<16x1xi32> to vector<16x1xf32>
    %c1_i32 = arith.constant 1 : i32
    %55 = vector.broadcast %c1_i32 : i32 to vector<16x1xi32>
    %56 = arith.addi %43, %55 : vector<16x1xi32>
    %c0_i32_12 = arith.constant 0 : i32
    %57 = vector.broadcast %c0_i32_12 : i32 to vector<16x1xi32>
    %58 = arith.cmpi sge, %56, %57 : vector<16x1xi32>
    %c1_i32_13 = arith.constant 1 : i32
    %59 = vector.broadcast %c1_i32_13 : i32 to vector<16x1xi32>
    %60 = arith.addi %43, %59 : vector<16x1xi32>
    %c16_i32_14 = arith.constant 16 : i32
    %61 = vector.broadcast %c16_i32_14 : i32 to vector<16x1xi32>
    %62 = arith.cmpi slt, %60, %61 : vector<16x1xi32>
    %63 = arith.andi %58, %62 : vector<16x1xi1>
    %64 = arith.extui %63 : vector<16x1xi1> to vector<16x1xi32>
    %65 = arith.sitofp %64 : vector<16x1xi32> to vector<16x1xf32>
    %66 = arith.truncf %40 : vector<16x32xf32> to vector<16x32xbf16>
    %cst_15 = arith.constant 0.000000e+00 : f32
    %67 = vector.broadcast %cst_15 : f32 to vector<16x32xf32>
    %c0_16 = arith.constant 0 : index
    %c0_17 = arith.constant 0 : index
    %68 = vector.load %arg4[%c0_16, %c0_17] : memref<32x96xbf16, #tpu.memory_space<vmem>>, vector<32x96xbf16>
    %cst_18 = arith.constant dense<0.000000e+00> : vector<16x96xf32>
    %69 = tpu.matmul %66, %68, %cst_18 {dimension_numbers = #tpu.dot_dimension_numbers<[1], [0], [0], [1], [0, 0, 1, 1], [], []>} : vector<16x32xbf16>, vector<32x96xbf16>, vector<16x96xf32> -> vector<16x96xf32>
    %70 = vector.extract_strided_slice %69 {offsets = [0, 0], sizes = [16, 32], strides = [1, 1]} : vector<16x96xf32> to vector<16x32xf32>
    %c1_i32_19 = arith.constant 1 : i32
    %71 = tpu.dynamic_rotate %70 by %c1_i32_19 dim 0 : vector<16x32xf32>, i32 -> vector<16x32xf32>
    %72 = vector.broadcast %54 : vector<16x1xf32> to vector<16x32xf32>
    %73 = arith.mulf %71, %72 : vector<16x32xf32>
    %74 = arith.addf %67, %73 : vector<16x32xf32>
    %75 = vector.extract_strided_slice %69 {offsets = [0, 32], sizes = [16, 32], strides = [1, 1]} : vector<16x96xf32> to vector<16x32xf32>
    %76 = arith.addf %74, %75 : vector<16x32xf32>
    %77 = vector.extract_strided_slice %69 {offsets = [0, 64], sizes = [16, 32], strides = [1, 1]} : vector<16x96xf32> to vector<16x32xf32>
    %c15_i32_20 = arith.constant 15 : i32
    %78 = tpu.dynamic_rotate %77 by %c15_i32_20 dim 0 : vector<16x32xf32>, i32 -> vector<16x32xf32>
    %79 = vector.broadcast %65 : vector<16x1xf32> to vector<16x32xf32>
    %80 = arith.mulf %78, %79 : vector<16x32xf32>
    %81 = arith.addf %76, %80 : vector<16x32xf32>
    %82 = vector.broadcast %5 : vector<1x32xf32> to vector<16x32xf32>
    %83 = arith.mulf %81, %82 : vector<16x32xf32>
    %84 = vector.broadcast %6 : vector<1x32xf32> to vector<16x32xf32>
    %85 = arith.addf %83, %84 : vector<16x32xf32>
    %86 = arith.negf %85 : vector<16x32xf32>
    %87 = math.exp %86 : vector<16x32xf32>
    %cst_21 = arith.constant 1.000000e+00 : f32
    %88 = vector.broadcast %cst_21 : f32 to vector<16x32xf32>
    %89 = arith.addf %88, %87 : vector<16x32xf32>
    %90 = arith.divf %88, %89 : vector<16x32xf32>
    %91 = arith.mulf %85, %90 : vector<16x32xf32>
    %92 = arith.truncf %91 : vector<16x32xf32> to vector<16x32xbf16>
    %c0_22 = arith.constant 0 : index
    %c0_23 = arith.constant 0 : index
    %93 = vector.load %arg5[%c0_22, %c0_23] : memref<32x32xbf16, #tpu.memory_space<vmem>>, vector<32x32xbf16>
    %cst_24 = arith.constant dense<0.000000e+00> : vector<16x32xf32>
    %94 = tpu.matmul %92, %93, %cst_24 {dimension_numbers = #tpu.dot_dimension_numbers<[1], [0], [0], [1], [0, 0, 1, 1], [], []>} : vector<16x32xbf16>, vector<32x32xbf16>, vector<16x32xf32> -> vector<16x32xf32>
    %95 = vector.broadcast %7 : vector<1x32xf32> to vector<16x32xf32>
    %96 = arith.addf %94, %95 : vector<16x32xf32>
    %97 = arith.addf %0, %96 : vector<16x32xf32>
    %c0_25 = arith.constant 0 : index
    %c0_26 = arith.constant 0 : index
    %98 = vector.load %arg6[%c0_25, %c0_26] : memref<16x32xf32, #tpu.memory_space<vmem>>, vector<16x32xf32>
    tpu.vector_store %arg6[%c0_25, %c0_26], %97 {strides = array<i32>} : memref<16x32xf32, #tpu.memory_space<vmem>>, vector<16x32xf32>,
    return
  }
  func.func @transform_0(%arg0: i32) -> (i32, i32) {
    %c0_i32 = arith.constant 0 : i32
    %c0_i32_0 = arith.constant 0 : i32
    return %arg0, %c0_i32 : i32, i32
  }
  func.func @transform_1(%arg0: i32) -> (i32, i32) {
    %c0_i32 = arith.constant 0 : i32
    %c0_i32_0 = arith.constant 0 : i32
    %c0_i32_1 = arith.constant 0 : i32
    return %c0_i32, %c0_i32_0 : i32, i32
  }
  func.func @transform_2(%arg0: i32) -> (i32, i32) {
    %c0_i32 = arith.constant 0 : i32
    %c0_i32_0 = arith.constant 0 : i32
    %c0_i32_1 = arith.constant 0 : i32
    return %c0_i32, %c0_i32_0 : i32, i32
  }
  func.func @transform_3(%arg0: i32) -> (i32, i32) {
    %c0_i32 = arith.constant 0 : i32
    %c0_i32_0 = arith.constant 0 : i32
    %c0_i32_1 = arith.constant 0 : i32
    return %c0_i32, %c0_i32_0 : i32, i32
  }
  func.func @transform_4(%arg0: i32) -> (i32, i32) {
    %c0_i32 = arith.constant 0 : i32
    %c0_i32_0 = arith.constant 0 : i32
    %c0_i32_1 = arith.constant 0 : i32
    return %c0_i32, %c0_i32_0 : i32, i32
  }
  func.func @transform_5(%arg0: i32) -> (i32, i32) {
    %c0_i32 = arith.constant 0 : i32
    %c0_i32_0 = arith.constant 0 : i32
    return %arg0, %c0_i32 : i32, i32
  }
}

</mosaic_0001>

<bundles_post_ra>
// kernel: tpu_custom_call.1
= control target key start
LH: loop header
LB: loop body
LE: loop exit
PB: predicated region body
PF: predicated region fallthrough
CT: control target
= control target key end

     0   :  { %10 = vsyncpa [#allocation3], 0  ;;  %s1488_s0 = inlined_call_operand.hbm [shape: f32[32,32], index: 0, kind: input, shape index: {}]   ;;  %s1489_s1 = inlined_call_operand.hbm [shape: f32[8,64], index: 1, kind: input, shape index: {}]   ;;  %s1490_s2 = inlined_call_operand.hbm [shape: bf16[32,64], index: 2, kind: input, shape index: {}]   ;;  %s1491_s3 = inlined_call_operand.hbm [shape: bf16[32,96], index: 3, kind: input, shape index: {}]   ;;  %s1492_s4 = inlined_call_operand.hbm [shape: bf16[32,32], index: 4, kind: input, shape index: {}]   ;;  %s1493_s5 = inlined_call_operand.hbm [shape: f32[32,32], index: 5, kind: output, shape index: {}]  }
   0x1   :  { %12 = vsyncpa [#allocation3 + $0x1], 0 }
   0x2   :  { %13 = vsyncpa [#allocation6], 0 }
   0x3   :  { %14 = vsyncpa [#allocation9], 0 }
   0x4   :  { %15 = vsyncpa [#allocation4], 0 }
   0x5   :  { %17 = vsyncpa [#allocation4 + $0x1], 0  ;;  %s1223_s18 = smov 0   ;;  %s1225_s19 = smov 0  }
   0x6   :  { %s1227_s20 = smov 0   ;;  %s1229_s21 = smov 0  }
   0x7 LB: > { %s1244_s22 = sadd.s32 4294967295, %s1175_s21   ;;  %s776_s23 = sadd.s32 4294967294, %s1175_s21   ;;  %s1175_s21 = sphi %s1229_s21, %s1517_s21   ;;  %s1171_s20 = sphi %s1227_s20, %s1516_s20   ;;  %s1167_s19 = sphi %s1225_s19, %s1515_s19   ;;  %s1163_s18 = sphi %s1223_s18, %s1514_s18  }
   0x8   : > { %p43_p0 = scmp.ne.s32.totalorder %s1167_s19, %s1163_s18  ;;  %p1494_p1 = scmp.eq.s32.totalorder %s1244_s22, 0 }
   0x9   : > { %p157_p3 = scmp.eq.s32.totalorder %s776_s23, 1  ;;  %p777_p5 = scmp.ge.s32.totalorder %s1175_s21, 1 }
   0xa   : > { %p1253_p4 = por %p1494_p1, %p43_p0  ;;  %p164_p7 = scmp.lt.s32.totalorder %s1175_s21, 3 }
   0xb   : > { %p1258_p6 = por %p157_p3, %p43_p0  ;;  %s1177_s27 = smov [#allocation5]  }
   0xc   : > { %s1498_s24 = scalar_select %p1253_p4, 1, 0 }
   0xd   : > { %s1499_s25 = scalar_select %p1258_p6, 1, 0 }
   0xe   : > { %p1263_p8 = pnand %p777_p5, %p164_p7  ;;  %s177_s28 = sshll.u32 %s1177_s27, 4  ;;  %s178_s28 = int_to_ptr.vmem [resolvable:$true] %s177_s28 }
   0xf   : > { %s1178_s30 = smov [#allocation8]   ;;  %s1179_s7 = smov [#allocation7]  }
  0x10   : > { %s1500_s26 = scalar_select %p1263_p8, 1, 0 }
  0x11   : > { %p868_p10 = pneg %p1263_p8  ;;  %s200_s6 = sshll.u32 %s1178_s30, 4  ;;  %s201_s6 = int_to_ptr.vmem [resolvable:$true] %s200_s6 }
  0x12   : > { %s187_s8 = sshll.u32 %s1179_s7, 4  ;;  %s982_s9 = scalar_lea.vmem %s178_s28, 128  ;;  %s188_s8 = int_to_ptr.vmem [resolvable:$true] %s187_s8 }
  0x13   : > { %p1272_p11 = pnand %p868_p10, %p1494_p1  ;;  %p983_p13 = scmp.ne.s32.totalorder %s178_s28, %s982_s9 }
  0x14   : > { %p990_p5 = scmp.lt.s32.totalorder %s178_s28, %s178_s28  ;;  %p991_p7 = scmp.lt.s32.totalorder %s982_s9, %s982_s9 }
  0x15   : > { %p973_p12 = pneg %p1272_p11 }
  0x16   : > { %p992_p10 = por %p991_p7, %p990_p5 }
  0x17   : > { %p985_p0 = pnand %p983_p13, %p973_p12 }
  0x19   : > { %p986_p3 = pneg %p985_p0 }
  0x1b   : > { %p993_p9 = pnand %p992_p10, %p986_p3 }
  0x1d   : > { %996 = shalt.err (!%p993_p9)
}
  0x1e   : > { %871 = dma.hbm_to_vmem [thread:$0]  (!%p1272_p11), %s1489_s1, 128, %s178_s28, [#allocation6]  }
  0x1f   : > { %s1008_s12 = scalar_lea.vmem %s201_s6, 256  ;;  %p1016_p13 = scmp.lt.s32.totalorder %s201_s6, %s201_s6 }
  0x20   : > { %p1009_p1 = scmp.ne.s32.totalorder %s201_s6, %s1008_s12  ;;  %p1017_p0 = scmp.lt.s32.totalorder %s1008_s12, %s1008_s12 }
  0x22   : > { %p1011_p2 = pnand %p1009_p1, %p973_p12  ;;  %p1018_p4 = por %p1017_p0, %p1016_p13 }
  0x24   : > { %p1012_p6 = pneg %p1011_p2 }
  0x26   : > { %p1019_p8 = pnand %p1018_p4, %p1012_p6 }
  0x28   : > { %1022 = shalt.err (!%p1019_p8)
}
  0x29   : > { %s1180_s13 = smov 64   ;;  %s1181_s14 = smov 4  }
  0x2a   : > { %877 = dma.hbm_to_vmem [thread:$0]  (!%p1272_p11), %s1491_s3, 256, %s201_s6, [#allocation9], %s1180_s13, %s1180_s13, %s1181_s14  }
  0x2b   : > { %s1034_s17 = scalar_lea.vmem %s188_s8, 256  ;;  %p1042_p3 = scmp.lt.s32.totalorder %s188_s8, %s188_s8 }
  0x2c   : > { %p1035_p9 = scmp.ne.s32.totalorder %s188_s8, %s1034_s17  ;;  %p1043_p5 = scmp.lt.s32.totalorder %s1034_s17, %s1034_s17 }
  0x2e   : > { %p1037_p1 = pnand %p1035_p9, %p973_p12  ;;  %p1044_p4 = por %p1043_p5, %p1042_p3 }
  0x30   : > { %p1038_p2 = pneg %p1037_p1 }
  0x32   : > { %p1045_p6 = pnand %p1044_p4, %p1038_p2 }
  0x34   : > { %1048 = shalt.err (!%p1045_p6)
}
  0x35   : > { %874 = dma.hbm_to_vmem [thread:$0]  (!%p1272_p11), %s1490_s2, 256, %s188_s8, [#allocation6], %s1180_s13, %s1180_s13, %s1181_s14  }
  0x36   : > { %s1182_s28 = smov [#allocation10]  }
  0x37   : > { %s213_s30 = sshll.u32 %s1182_s28, 4  ;;  %s214_s30 = int_to_ptr.vmem [resolvable:$true] %s213_s30 }
  0x38   : > { %s1060_s6 = scalar_lea.vmem %s214_s30, 256  ;;  %p1068_p13 = scmp.lt.s32.totalorder %s214_s30, %s214_s30 }
  0x39   : > { %p1061_p8 = scmp.ne.s32.totalorder %s214_s30, %s1060_s6  ;;  %p1069_p0 = scmp.lt.s32.totalorder %s1060_s6, %s1060_s6 }
  0x3b   : > { %p1063_p7 = pnand %p1061_p8, %p973_p12  ;;  %p1070_p9 = por %p1069_p0, %p1068_p13 }
  0x3d   : > { %p1064_p10 = pneg %p1063_p7 }
  0x3f   : > { %p1071_p1 = pnand %p1070_p9, %p1064_p10 }
  0x41   : > { %1074 = shalt.err (!%p1071_p1)
}
  0x42   : > { %880 = dma.hbm_to_vmem [thread:$0]  (!%p1272_p11), %s1492_s4, 256, %s214_s30, [#allocation9], %s1180_s13, %s1180_s13, %s1181_s14  }
  0x43   : > { %s1311_s8 = sadd.s32 1, %s1175_s21   ;;  %s30_s10 = sadd.s32 1, %s1171_s20 }
  0x44   : > { %s27_s29 = ssub.s32 %s1175_s21, %s1311_s8  ;;  %p37_p12 = scmp.ne.s32.totalorder %s1171_s20, %s1167_s19 }
  0x45   : > { %p28_p2 = scmp.eq.s32.totalorder %s27_s29, 0  ;;  %p38_p3 = scmp.eq.s32.totalorder %s1175_s21, 0 }
  0x46   : > { %p1502_p5 = scmp.eq.s32.totalorder %s1244_s22, 1  ;;  %p893_p6 = scmp.lt.s32.totalorder %s1175_s21, 2 }
  0x47   : > { %s1327_s12 = scalar_select %p28_p2, %s1171_s20, %s30_s10  }
  0x48   : > { %p1321_p4 = por %p1502_p5, %p37_p12  ;;  %p39_p8 = por %p38_p3, %p37_p12 }
  0x49   : > { %s227_s15 = sand.u32 1, %s1171_s20   ;;  %s813_s13 = sshll.u32 %s1175_s21, 8 }
  0x4a   : > { %s1503_s11 = scalar_select %p1321_p4, 1, 0 }
  0x4b   : > { %s783_s16 = sshll.u32 %s227_s15, 4  ;;  %s1334_s23 = scalar_lea.hbm %s1488_s0, %s813_s13 }
  0x4c   : > { %s231_s27 = scalar_lea.vmem [#allocation2], %s783_s16  ;;  %p1338_p11 = pnand %p893_p6, %p39_p8 }
  0x4d   : > { %s238_s28 = sshll.u32 %s231_s27, 4  ;;  %s1342_s6 = scalar_lea.sflag [#allocation3], %s227_s15  ;;  %s1336_s28 = int_to_ptr.vmem [resolvable:$true] %s238_s28 }
  0x4e   : > { %s1075_s7 = scalar_lea.hbm %s1334_s23, 256  ;;  %p1077_p10 = pneg %p1338_p11 }
  0x4f   : > { %p1076_p7 = scmp.ne.s32.totalorder %s1334_s23, %s1075_s7  ;;  %s1080_s29 = scalar_lea.hbm %s1488_s0, 512 }
  0x50   : > { %p1081_p9 = scmp.lt.s32.totalorder %s1334_s23, %s1488_s0  ;;  %p1082_p1 = scmp.lt.s32.totalorder %s1080_s29, %s1075_s7 }
  0x51   : > { %p1078_p13 = pnand %p1077_p10, %p1076_p7 }
  0x52   : > { %p1083_p12 = por %p1082_p1, %p1081_p9 }
  0x53   : > { %p1079_p0 = pneg %p1078_p13 }
  0x55   : > { %p1084_p2 = pnand %p1083_p12, %p1079_p0 }
  0x57   : > { %1087 = shalt.err (!%p1084_p2)
}
  0x58   : > { %s1088_s15 = scalar_lea.vmem %s1336_s28, 256  ;;  %s1183_s14 = smov [#allocation2]  }
  0x59   : > { %p1089_p3 = scmp.ne.s32.totalorder %s1336_s28, %s1088_s15  ;;  %s1093_s17 = sshll.u32 %s1183_s14, 4  ;;  %s1094_s17 = int_to_ptr.vmem [resolvable:$false] %s1093_s17 }
  0x5a   : > { %s1095_s27 = scalar_lea.vmem %s1094_s17, 512  ;;  %p1096_p8 = scmp.lt.s32.totalorder %s1336_s28, %s1094_s17 }
  0x5b   : > { %p1091_p5 = pnand %p1089_p3, %p1077_p10  ;;  %p1097_p7 = scmp.lt.s32.totalorder %s1095_s27, %s1088_s15 }
  0x5d   : > { %p1092_p6 = pneg %p1091_p5  ;;  %p1098_p13 = por %p1097_p7, %p1096_p8 }
  0x5f   : > { %p1099_p4 = pnand %p1098_p13, %p1092_p6 }
  0x61   : > { %1102 = shalt.err (!%p1099_p4)
}
  0x62   : > { %s1184_s7 = smov 128   ;;  %s1185_s9 = smov 8  }
  0x63   : > { %884 = dma.hbm_to_vmem [thread:$0]  (!%p1338_p11), %s1334_s23, 256, %s1336_s28, %s1342_s6, %s1184_s7, %s1184_s7, %s1185_s9  }
  0x64   : > { %p1505_p10 = scmp.ne.s32.totalorder %s1500_s26, 0 }
  0x65   : > { %s1366_s10 = sand.u32 (!%p1505_p10), 1, %s1167_s19   ;;  %p1506_p4 = scmp.ne.s32.totalorder (!%p1505_p10), %s1498_s24, 0 }
  0x66   : > { %250 = sbr.rel (%p1505_p10) target bundleno = 1355 (0x54b), region = 40  ;;  %s787_s29 = sshll.u32 (!%p1505_p10), %s1366_s10, 4 }
  0x67   : > { %s253_s16 = scalar_lea.sflag (!%p1505_p10), [#allocation3], %s1366_s10  ;;  %s256_s13 = scalar_lea.vmem (!%p1505_p10), [#allocation2], %s787_s29 }
  0x6b   : > { %1146 = dma.done.wait (%p1506_p4), %s253_s16, 256  }
  0x6c   : > { %1148 = vsyncadd (%p1506_p4), %s253_s16, 4294967040  ;;  %p1507_p11 = scmp.eq.s32.totalorder %s1244_s22, 0 }
  0x6e   : > { %1150 = dma.done.wait (%p1507_p11), [#allocation6], 384   ;;  %p1508_p0 = pmov %p1507_p11 }
  0x70   : > { %1152 = vsyncadd (%p1508_p0), [#allocation6], 4294966912  ;;  %p1509_p9 = pmov %p1508_p0 }
  0x71   : > { %p1510_p1 = pmov %p1508_p0 }
  0x72   : > { %1154 = dma.done.wait (%p1509_p9), [#allocation9], 512  }
  0x73   : > { %1156 = vsyncadd (%p1510_p1), [#allocation9], 4294966784  ;;  %vm305_vm0 = vcmask 261120   ;;  %v1384_v0 = vld [vmem:[%s256_s13] sm:$0xff]  ;;  %v1386_v1 = vld [vmem:[%s256_s13 + $0x8] sm:$0xff]  ;;  %v1186_v15 = vmov 0.0   ;;  %v333_v23 = vlaneseq }
  0x74   : > { %v306_v2 = vsel %vm305_vm0, %v1384_v0, 0.0  ;;  %v309_v3 = vsel %vm305_vm0, %v1386_v1, 0.0  ;;  %v945_v14 = vld [vmem:[#allocation7 + $0x8] sm:$0xff]   ;;  %824 = vmatprep.subr.bf16.mxu0 %v1186_v15  ;;  %vm1187_vm1 = vmmov 0   ;;  %v946_v16 = vld [vmem:[#allocation7] sm:$0xff]   ;;  %832 = vmatprep.subr.bf16.mxu1 %v1186_v15  ;;  %v1407_v26 = vld [vmem:[#allocation5] sm:$0xff] }
  0x75   : > { %307 = vadd.xlane.f32.xlu0 %v306_v2  ;;  %828 = vmatprep.mubr.msk.bf16.mxu0 %vm1187_vm1, %v1186_v15  ;;  %v1404_v24 = vshrl.u32 %v333_v23, 7  ;;  %v947_v51 = vld [vmem:[#allocation8 + $0x8] sm:$0xff]   ;;  %v948_v54 = vld [vmem:[#allocation8] sm:$0xff]   ;;  %s1188_s24 = smov 96   ;;  %s1189_s26 = smov 64  }
  0x76   : > { %825 = vmatpush3.bf16.msra.mxu0 %v945_v14  ;;  %836 = vmatprep.mubr.msk.bf16.mxu1 %vm1187_vm1, %v1186_v15  ;;  %s814_s23 = sshll.u32 %s1244_s22, 8  ;;  %s298_s28 = scalar_lea.vmem [#allocation11], %s787_s29 }
  0x77   : > { %826 = vmatprep.subr.bf16.mxu0 %v1186_v15  ;;  %v335_v25 = vsub.s32 0, %v1404_v24  ;;  %v341_v30 = vsub.s32 1, %v1404_v24  ;;  %v352_v39 = vsub.s32 2, %v1404_v24  ;;  %833 = vmatpush3.bf16.msra.mxu1 %v947_v51  ;;  %vm524_vm2 = vcmp.lt.s32.totalorder %v1404_v24, 1  ;;  %s665_s30 = sshll.u32 %s298_s28, 4  ;;  %s1441_s14 = scalar_lea.hbm %s1493_s5, %s814_s23  ;;  %s1443_s30 = int_to_ptr.vmem [resolvable:$true] %s665_s30 }
  0x78   : > { %834 = vmatprep.subr.bf16.mxu1 %v1186_v15  ;;  %vm549_vm5 = vcmp.lt.s32.totalorder %v1404_v24, 7  ;;  %s652_s22 = scalar_lea.sflag [#allocation4], %s1366_s10  ;;  %s1103_s17 = scalar_lea.vmem %s1443_s30, 256 }
  0x79   : > { %310 = vadd.xlane.f32.xlu0 %v309_v3  ;;  %v336_v29 = vrot.slane %v1407_v26, %v335_v25  ;;  %v342_v34 = vrot.slane %v1407_v26, %v341_v30  ;;  %v353_v40 = vrot.slane %v1407_v26, %v352_v39  ;;  %p1104_p12 = scmp.ne.s32.totalorder %s1443_s30, %s1103_s17  ;;  %p1511_p2 = scmp.ne.s32.totalorder %s1503_s11, 0 }
  0x7a   : > { %827 = vmatpush3.bf16.msra.mxu0 %v946_v16  ;;  %s1190_s27 = smov [#allocation11]  }
  0x7b   : > { %840 = vmatprep.subr.bf16.mxu0 %v1186_v15  ;;  %835 = vmatpush3.bf16.msra.mxu1 %v948_v54  ;;  %p1105_p3 = pnand %p1104_p12, %p1511_p2  ;;  %s1107_s7 = sshll.u32 %s1190_s27, 4  ;;  %s1108_s7 = int_to_ptr.vmem [resolvable:$false] %s1107_s7 }
  0x7c   : > { %s1109_s9 = scalar_lea.vmem %s1108_s7, 512  ;;  %p1110_p6 = scmp.lt.s32.totalorder %s1443_s30, %s1108_s7 }
  0x7d   : > { %p1106_p5 = pneg %p1105_p3  ;;  %p1111_p8 = scmp.lt.s32.totalorder %s1109_s9, %s1103_s17 }
  0x7f   : > { %p1112_p7 = por %p1111_p8, %p1110_p6 }
  0x81   : > { %p1113_p13 = pnand %p1112_p7, %p1106_p5 }
  0xfe   : > { %v308_v4 = vpop.xlane.xlu0 %307 }
  0xff   : > { %v313_v5 = vmul.f32 0.03125, %v308_v4 }
 0x101   : > { %v315_v6 = vsub.f32 %v1384_v0, %v313_v5 }
 0x102   : > { %v311_v7 = vpop.xlane.xlu0 %310 }
 0x103   : > { %v314_v8 = vmul.f32 0.03125, %v311_v7  ;;  %v317_v9 = vmul.f32 %v315_v6, %v315_v6 }
 0x105   : > { %v316_v10 = vsub.f32 %v1386_v1, %v314_v8  ;;  %v319_v11 = vsel %vm305_vm0, %v317_v9, 0.0  ;;  %v949_v8 = vld [vmem:[#allocation10 + $0x8] sm:$0xff]   ;;  %v950_v9 = vld [vmem:[#allocation10] sm:$0xff]  }
 0x106   : > { %320 = vadd.xlane.f32.xlu1 %v319_v11  ;;  %v434_v11 = vadd.s32 8, %v1404_v24 }
 0x107   : > { %v318_v12 = vmul.f32 %v316_v10, %v316_v10 }
 0x109   : > { %v322_v13 = vsel %vm305_vm0, %v318_v12, 0.0 }
 0x10a   : > { %323 = vadd.xlane.f32.xlu1 %v322_v13  ;;  %v436_v13 = vand.u32 15, %v434_v11 }
 0x10c   : > { %v450_v14 = vadd.s32 1, %v436_v13 }
 0x10e   : > { %vm454_vm4 = vcmp.lt.s32.totalorder %v450_v14, 16 }
 0x18f   : > { %v321_v17 = vpop.xlane.xlu1 %320 }
 0x190   : > { %v325_v18 = vmul.f32 0.03125, %v321_v17 }
 0x192   : > { %v327_v19 = vadd.f32 1e-05, %v325_v18  ;;  %v558_v18 = vsub.s32 3, %v1404_v24 }
 0x193   : > { %v324_v20 = vpop.xlane.xlu1 %323 }
 0x194   : > { %951 = vrsqrt.f32 %v327_v19  ;;  %v326_v21 = vmul.f32 0.03125, %v324_v20 }
 0x196   : > { %v328_v22 = vadd.f32 1e-05, %v326_v21 }
 0x198   : > { %953 = vrsqrt.f32 %v328_v22  ;;  %v564_v22 = vsub.s32 4, %v1404_v24 }
 0x1a1   : > { %v952_v27 = vpop.eup %951 }
 0x1a2   : > { %v331_v28 = vmul.f32 %v952_v27, %v315_v6  ;;  %v799_v27 = vsel %vm454_vm4, 1.0, %v1186_v15 }
 0x1a4   : > { %v337_v33 = vmul.f32 %v336_v29, %v331_v28 }
 0x1a5   : > { %v954_v31 = vpop.eup %953 }
 0x1a6   : > { %v332_v32 = vmul.f32 %v954_v31, %v316_v10  ;;  %v343_v36 = vadd.f32 %v342_v34, %v337_v33  ;;  %v435_v10 = vand.u32 15, %v1404_v24 }
 0x1a8   : > { %v338_v35 = vmul.f32 %v336_v29, %v332_v32  ;;  %v437_v12 = vadd.s32 4294967295, %v435_v10  ;;  %v559_v29 = vrot.slane %v1407_v26, %v558_v18 }
 0x1aa   : > { %v344_v37 = vadd.f32 %v342_v34, %v338_v35  ;;  %vm439_vm3 = vcmp.ge.s32.totalorder %v437_v12, 0  ;;  %v565_v34 = vrot.slane %v1407_v26, %v564_v22 }
 0x1ab   : > { %v798_v17 = vsel %vm439_vm3, 1.0, %v1186_v15 }
 0x1ac   : > { %v345_v38 = vpack.c.bf16 %v344_v37, %v343_v36 }
 0x1ae   : > { %829 = vmatmul.mubr.msk.bf16.vlgmr.msra.gmra.mxu0 %vm305_vm0, %v345_v38 }
 0x1af   : > { %844 = vmatprep.mubr.msk.bf16.mxu0 %vm1187_vm1, %v1186_v15  ;;  %841 = vmatpush3.bf16.msra.mxu0 %v949_v8 }
 0x1b0   : > { %842 = vmatprep.subr.bf16.mxu0 %v1186_v15 }
 0x1b3   : > { %843 = vmatpush3.bf16.msra.mxu0 %v950_v9 }
 0x26e   : > { %v403_v41 = vpop.f32.mrf.mxu0 }
 0x26f   : > { %v404_v42 = vadd.f32 %v403_v41, %v353_v40 }
 0x270   : > { %v830_v43 = vpop.f32.mrf.mxu0 }
 0x271   : > { %v796_v44 = vmul.f32 -1.442695, %v404_v42 }
 0x272   : > { %v406_v45 = vpop.f32.mrf.mxu0 }
 0x273   : > { %955 = vpow2.f32 %v796_v44  ;;  %v407_v46 = vadd.f32 %v406_v45, %v353_v40 }
 0x274   : > { %v831_v47 = vpop.f32.mrf.mxu0 }
 0x275   : > { %v797_v48 = vmul.f32 -1.442695, %v407_v46 }
 0x277   : > { %957 = vpow2.f32 %v797_v48 }
 0x280   : > { %v956_v49 = vpop.eup %955 }
 0x281   : > { %v416_v50 = vadd.f32 1.0, %v956_v49 }
 0x283   : > { %959 = vrcp.f32 %v416_v50 }
 0x284   : > { %v958_v52 = vpop.eup %957 }
 0x285   : > { %v417_v53 = vadd.f32 1.0, %v958_v52  ;;  %v589_v52 = vsub.s32 5, %v1404_v24 }
 0x287   : > { %961 = vrcp.f32 %v417_v53  ;;  %v590_v53 = vrot.slane %v1407_v26, %v589_v52 }
 0x290   : > { %v960_v55 = vpop.eup %959 }
 0x291   : > { %424 = vrot.lane.b32.xlu0 %v960_v55, %s1188_s24 }
 0x294   : > { %v962_v56 = vpop.eup %961 }
 0x295   : > { %426 = vrot.lane.b32.xlu1 %v962_v56, %s1188_s24 }
 0x303   : > { %v425_v57 = vpop.permute.xlu0 %424 }
 0x304   : > { %v430_v59 = vmul.f32 %v425_v57, %v404_v42 }
 0x307   : > { %v427_v58 = vpop.permute.xlu1 %426 }
 0x308   : > { %v431_v60 = vmul.f32 %v427_v58, %v407_v46 }
 0x30a   : > { %v461_v61 = vpack.c.bf16 %v431_v60, %v430_v59 }
 0x30c   : > { %837 = vmatmul.mubr.msk.bf16.vlgmr.msra.gmra.mxu1 %vm305_vm0, %v461_v61 }
 0x3cc   : > { %v515_v62 = vpop.f32.mrf.mxu1 }
 0x3cd   : > { %533 = vrot.lane.b32.xlu0 %v515_v62, %s1188_s24  ;;  %541 = vrot.lane.b32.xlu1 %v515_v62, %s1189_s26  ;;  %v522_v3 = vrot.slane %v515_v62, 7 }
 0x3ce   : > { %v838_v63 = vpop.f32.mrf.mxu1 }
 0x3d0   : > { %v518_v2 = vpop.f32.mrf.mxu1 }
 0x3d1   : > { %v523_v4 = vrot.slane %v518_v2, 7  ;;  %543 = vrot.lane.b32.xlu1 %v518_v2, %s1189_s26 }
 0x3d2   : > { %v839_v5 = vpop.f32.mrf.mxu1 }
 0x3d3   : > { %v526_v6 = vsel %vm524_vm2, %v523_v4, %v522_v3  ;;  %v525_v7 = vsel %vm524_vm2, %v522_v3, %v523_v4 }
 0x3d4   : > { %v527_v20 = vmul.f32 %v798_v17, %v526_v6 }
 0x3d5   : > { %535 = vrot.lane.b32.xlu1 %v518_v2, %s1188_s24 }
 0x43f   : > { %v542_v16 = vpop.permute.xlu1 %541  ;;  %v534_v19 = vpop.permute.xlu0 %533 }
 0x440   : > { %v547_v23 = vrot.slane %v542_v16, 1  ;;  %v539_v28 = vadd.f32 %v534_v19, %v527_v20 }
 0x443   : > { %v544_v21 = vpop.permute.xlu1 %543 }
 0x444   : > { %v548_v25 = vrot.slane %v544_v21, 1 }
 0x446   : > { %v550_v30 = vsel %vm549_vm5, %v547_v23, %v548_v25  ;;  %v551_v31 = vsel %vm549_vm5, %v548_v25, %v547_v23 }
 0x447   : > { %v554_v32 = vadd.f32 %v550_v30, %v539_v28  ;;  %v553_v33 = vmul.f32 %v799_v27, %v551_v31  ;;  %v536_v35 = vpop.permute.xlu1 %535 }
 0x448   : > { %v540_v36 = vadd.f32 %v536_v35, %v525_v7 }
 0x449   : > { %v560_v37 = vmul.f32 %v559_v29, %v554_v32 }
 0x44a   : > { %v555_v38 = vadd.f32 %v553_v33, %v540_v36 }
 0x44b   : > { %v566_v39 = vadd.f32 %v565_v34, %v560_v37 }
 0x44c   : > { %v561_v40 = vmul.f32 %v559_v29, %v555_v38 }
 0x44d   : > { %v803_v41 = vmul.f32 -1.442695, %v566_v39 }
 0x44e   : > { %v567_v42 = vadd.f32 %v565_v34, %v561_v40 }
 0x44f   : > { %963 = vpow2.f32 %v803_v41 }
 0x450   : > { %v804_v43 = vmul.f32 -1.442695, %v567_v42 }
 0x452   : > { %965 = vpow2.f32 %v804_v43 }
 0x45c   : > { %v964_v15 = vpop.eup %963 }
 0x45d   : > { %v574_v44 = vadd.f32 1.0, %v964_v15 }
 0x45f   : > { %v966_v45 = vpop.eup %965  ;;  %967 = vrcp.f32 %v574_v44 }
 0x460   : > { %v575_v46 = vadd.f32 1.0, %v966_v45 }
 0x462   : > { %969 = vrcp.f32 %v575_v46 }
 0x46c   : > { %v968_v47 = vpop.eup %967 }
 0x46d   : > { %v580_v49 = vmul.f32 %v968_v47, %v566_v39 }
 0x46f   : > { %v970_v48 = vpop.eup %969 }
 0x470   : > { %v581_v50 = vmul.f32 %v970_v48, %v567_v42 }
 0x472   : > { %v582_v51 = vpack.c.bf16 %v581_v50, %v580_v49 }
 0x474   : > { %845 = vmatmul.mubr.msk.bf16.vlgmr.msra.gmra.mxu0 %vm305_vm0, %v582_v51 }
 0x534   : > { %v640_v54 = vpop.f32.mrf.mxu0 }
 0x535   : > { %v641_v55 = vadd.f32 %v640_v54, %v590_v53 }
 0x536   : > { %v846_v56 = vpop.f32.mrf.mxu0 }
 0x537   : > { %v647_v57 = vadd.f32 %v641_v55, %v1384_v0 }
 0x538   : > { %v643_v58 = vpop.f32.mrf.mxu0 }
 0x539   : > { %649 = vst.msk [vmem:[%s298_s28] sm:$0xff] %vm305_vm0, %v647_v57  ;;  %v644_v59 = vadd.f32 %v643_v58, %v590_v53 }
 0x53a   : > { %v847_v60 = vpop.f32.mrf.mxu0 }
 0x53b   : > { %v648_v0 = vadd.f32 %v644_v59, %v1386_v1 }
 0x53d   : > { %650 = vst.msk [vmem:[%s298_s28 + $0x8] sm:$0xff] %vm305_vm0, %v648_v0 }
 0x53e   : > { %1116 = shalt.err (!%p1113_p13)
}
 0x53f   : > { %s1117_s29 = scalar_lea.hbm %s1441_s14, 256  ;;  %s1121_s24 = scalar_lea.hbm %s1493_s5, 512 }
 0x540   : > { %p1118_p10 = scmp.ne.s32.totalorder %s1441_s14, %s1117_s29  ;;  %p1122_p0 = scmp.lt.s32.totalorder %s1441_s14, %s1493_s5 }
 0x541   : > { %p1123_p9 = scmp.lt.s32.totalorder %s1121_s24, %s1117_s29 }
 0x542   : > { %p1119_p4 = pnand %p1118_p10, %p1511_p2 }
 0x543   : > { %p1124_p1 = por %p1123_p9, %p1122_p0 }
 0x544   : > { %p1120_p11 = pneg %p1119_p4 }
 0x546   : > { %p1125_p12 = pnand %p1124_p1, %p1120_p11 }
 0x548   : > { %1128 = shalt.err (!%p1125_p12)
}
 0x549   : > { %s1191_s28 = smov 128   ;;  %s1192_s6 = smov 8  }
 0x54a   : > { %866 = dma.vmem_to_hbm [thread:$0]  (%p1511_p2), %s1443_s30, 256, %s1441_s14, %s652_s22, %s1191_s28, %s1191_s28, %s1192_s6  }
 0x54b PF: > { %s680_s15 = sand.u32 1, %s1163_s18   ;;  %p1512_p3 = scmp.ne.s32.totalorder %s1499_s25, 0 }
 0x54c   : > { %p1513_p5 = scmp.ge.s32.totalorder %s1175_s21, 2  ;;  %s681_s17 = scalar_lea.sflag [#allocation4], %s680_s15 }
 0x54e   : > { %p886_p6 = pnand %p1513_p5, %p1512_p3 }
 0x550   : > { %p887_p8 = pneg %p886_p6 }
 0x552   : > { %1158 = dma.done.wait (%p887_p8), %s681_s17, 256  }
 0x553   : > { %1160 = vsyncadd (%p887_p8), %s681_s17, 4294967040  ;;  %p20_p7 = scmp.ge.s32.totalorder %s1311_s8, 4   ;;  %s1514_s18 = smov %s1167_s19 }
 0x554   : > { %s1515_s19 = smov %s1171_s20  ;;  %s1516_s20 = smov %s1327_s12 }
 0x555   : > { %s1517_s21 = smov %s1311_s8  ;;  %22 = sbr.rel (!%p20_p7) target bundleno = 7 (0x7), region = 101 }
 0x55a   :  { %686 = vsyncpa [#allocation3], 1 }
 0x55b   :  { %688 = vsyncpa [#allocation3 + $0x1], 1 }
 0x55c   :  { %689 = vsyncpa [#allocation6], 1 }
 0x55d   :  { %690 = vsyncpa [#allocation9], 1 }
 0x55e   :  { %691 = vsyncpa [#allocation4], 1 }
 0x55f   :  { %693 = vsyncpa [#allocation4 + $0x1], 1 }

</bundles_post_ra>
